<compile_context>
chip_gen: v6e
topology: v6e:2x2x1
jax: 0.10.0
libtpu: 0.0.40
codegen_flags: <defaults>
</compile_context>

<pallas_src>
import functools
import math

import jax
import jax.numpy as jnp
from jax.experimental import pallas as pl
from jax.experimental.pallas import tpu as pltpu


def _issue_tile_gather(tok_ref, table_hbm, buf, sem, *, tile, slot, tn):
    """Issue one row-gather DMA per token of `tile` into buffer slot `slot`."""
    base = tile * tn

    @pl.loop(0, tn)
    def _issue(t):
        row = tok_ref[base + t]
        pltpu.make_async_copy(
            table_hbm.at[pl.ds(row, 1)],        # (1, D) table row in HBM
            buf.at[pl.ds(slot * tn + t, 1)],    # (1, D) row in the VMEM buffer
            sem.at[slot],
        ).start()


def _wait_tile_gather(table_hbm, buf, sem, *, slot, tn):
    """Drain the `tn` row copies of buffer slot `slot` (one wait per row)."""

    @pl.loop(0, tn)
    def _drain(t):
        pltpu.make_async_copy(
            table_hbm.at[pl.ds(0, 1)],          # shape-only descriptor for wait
            buf.at[pl.ds(slot * tn + t, 1)],
            sem.at[slot],
        ).wait()


def _gather_kernel(tok_ref, table_hbm, out_ref, buf, sem, *, scale, tn):
    # tok_ref   : (N_pad,)           int32  SMEM (scalar prefetch) — token ids
    # table_hbm : (V, D)             f32    HBM (pl.ANY) — embedding table
    # out_ref   : (tn, D)            f32    VMEM output tile
    # buf       : (2*tn, D)          f32    VMEM gather buffer (2 slots)
    # sem       : (2,) DMA semaphores, one per slot
    i = pl.program_id(0)
    n = pl.num_programs(0)
    slot = i % 2

    # Prologue: the very first tile has nothing prefetched yet.
    @pl.when(i == 0)
    def _():
        _issue_tile_gather(tok_ref, table_hbm, buf, sem,
                           tile=i, slot=slot, tn=tn)

    # Prefetch the NEXT tile's rows into the other slot, so the DMA engine
    # keeps working while this step waits / scales / writes back.
    @pl.when(i + 1 < n)
    def _():
        _issue_tile_gather(tok_ref, table_hbm, buf, sem,
                           tile=i + 1, slot=(i + 1) % 2, tn=tn)

    # Wait for the current tile's rows, scale by sqrt(embedding_dim), store
    # (single VPU pass over the tile; output HBM writeback is auto-pipelined).
    _wait_tile_gather(table_hbm, buf, sem, slot=slot, tn=tn)
    start = pl.multiple_of(slot * tn, tn)
    out_ref[...] = (buf[pl.ds(start, tn), :] * scale).astype(out_ref.dtype)


def token_embedding(tokens, table, *, token_tile=128):
    """tokens: (B, S) int, table: (V, D) float32 -> (B, S, D) float32.

    Matches TokenEmbedding.forward: embedding(tokens.long()) * sqrt(embedding_dim).
    """
    B, S = tokens.shape
    V, D = table.shape
    N = B * S
    scale = math.sqrt(float(D))

    # Output block's sublane dim must be a multiple of 8 (or the full dim).
    token_tile = max(8, int(token_tile))
    token_tile += (-token_tile) % 8

    # Flatten + pad the token stream to a multiple of token_tile (padded rows
    # gather row 0 and are sliced off afterwards), so arbitrary (B, S) work.
    n_steps = pl.cdiv(N, token_tile)
    n_pad = n_steps * token_tile
    tok_flat = tokens.reshape(N).astype(jnp.int32)
    # TODO(synk): PyTorch nn.Embedding raises on out-of-range ids; we clamp to
    # keep the HBM gather in-bounds instead of faulting.
    tok_flat = jnp.clip(tok_flat, 0, V - 1)
    if n_pad != N:
        tok_flat = jnp.concatenate(
            [tok_flat, jnp.zeros((n_pad - N,), jnp.int32)])

    out_flat = pl.pallas_call(
        functools.partial(_gather_kernel, scale=scale, tn=token_tile),
        out_shape=jax.ShapeDtypeStruct((n_pad, D), table.dtype),
        grid_spec=pltpu.PrefetchScalarGridSpec(
            num_scalar_prefetch=1,                  # token ids -> SMEM
            grid=(n_steps,),
            in_specs=[
                pl.BlockSpec(memory_space=pl.ANY),  # table stays in HBM
            ],
            out_specs=pl.BlockSpec((token_tile, D), lambda i, tok: (i, 0)),
            scratch_shapes=[
                pltpu.VMEM((2 * token_tile, D), table.dtype),  # 2-slot buffer
                pltpu.SemaphoreType.DMA((2,)),                 # per-slot sems
            ],
        ),
        # Cross-step prefetch relies on sequential iteration order, so the
        # token axis is "arbitrary" (near-zero cost on 1-TC chips).
        compiler_params=pltpu.CompilerParams(
            dimension_semantics=("arbitrary",)),
    )(tok_flat, table)

    return out_flat[:N].reshape(B, S, D)


if __name__ == "__main__":
    # Module config (small, consistent with TokenEmbedding(vocab, dim, pad)).
    vocabulary_size = 32
    embedding_dim = 32
    padding_idx = 0
    B, S = 2, 8

    key = jax.random.PRNGKey(0)
    k_tab, k_tok = jax.random.split(key)

    # Deterministic init matching nn.Embedding: N(0,1) weights with the
    # padding_idx row zeroed.
    table = jax.random.normal(k_tab, (vocabulary_size, embedding_dim),
                              dtype=jnp.float32)
    table = table.at[padding_idx].set(0.0)

    tokens = jax.random.randint(k_tok, (B, S), 0, vocabulary_size,
                                dtype=jnp.int32)

    out = token_embedding(tokens, table, token_tile=8)
    out = jax.block_until_ready(out)

    # Reference check (plain JAX gather + scale).
    ref = jnp.take(table, tokens, axis=0) * math.sqrt(embedding_dim)
    assert out.shape == (B, S, embedding_dim)
    assert jnp.allclose(out, ref, atol=1e-5), "mismatch vs reference gather"

    print("KERNEL_OK")
</pallas_src>

<mosaic_0001>
module attributes {stable_mosaic.version = 11 : i64} {
  func.func @_gather_kernel(%arg0: i32, %arg1: memref<16xi32, #tpu.memory_space<smem>>, %arg2: memref<32x32xf32, #tpu.memory_space<any>>, %arg3: memref<8x32xf32, #tpu.memory_space<vmem>>, %arg4: memref<16x32xf32, #tpu.memory_space<vmem>>, %arg5: memref<2x!tpu.dma_semaphore, #tpu.memory_space<semaphore_mem>>) attributes {dimension_semantics = [#tpu.dimension_semantics<arbitrary>], iteration_bounds = array<i64: 2>, scalar_prefetch = 1 : i64, scratch_operands = 2 : i64, tpu.core_type = #tpu.core_type<tc>, window_params = [{}, {transform_indices = @transform_1, window_bounds = array<i64: 8, 32>}]} {
    %c2_i32 = arith.constant 2 : i32
    %c0_i32 = arith.constant 0 : i32
    %0 = arith.cmpi eq, %c2_i32, %c0_i32 : i32
    %c1_i32 = arith.constant 1 : i32
    %1 = arith.select %0, %c1_i32, %c2_i32 : i32
    %2 = arith.remsi %arg0, %1 : i32
    %c0_i32_0 = arith.constant 0 : i32
    %3 = arith.cmpi ne, %2, %c0_i32_0 : i32
    %c0_i32_1 = arith.constant 0 : i32
    %4 = arith.cmpi slt, %2, %c0_i32_1 : i32
    %c0_i32_2 = arith.constant 0 : i32
    %5 = arith.cmpi slt, %1, %c0_i32_2 : i32
    %6 = arith.xori %4, %5 : i1
    %7 = arith.andi %6, %3 : i1
    %8 = arith.addi %2, %1 : i32
    %9 = arith.select %7, %8, %2 : i32
    %c0_i32_3 = arith.constant 0 : i32
    %10 = arith.cmpi eq, %arg0, %c0_i32_3 : i32
    %11 = arith.extui %10 : i1 to i32
    %c0_i32_4 = arith.constant 0 : i32
    %12 = arith.cmpi ne, %11, %c0_i32_4 : i32
    scf.if %12 {
      %c8_i32_14 = arith.constant 8 : i32
      %25 = arith.muli %arg0, %c8_i32_14 : i32
      %c0_i32_15 = arith.constant 0 : i32
      %c8_i32_16 = arith.constant 8 : i32
      %26 = arith.addi %c0_i32_15, %c8_i32_16 : i32
      %c1_i32_17 = arith.constant 1 : i32
      scf.for %arg6 = %c0_i32_15 to %26 step %c1_i32_17  : i32 {
        %c1_i32_19 = arith.constant 1 : i32
        %27 = arith.muli %arg6, %c1_i32_19 : i32
        %c0_i32_20 = arith.constant 0 : i32
        %28 = arith.addi %c0_i32_20, %27 : i32
        %29 = arith.addi %25, %28 : i32
        %30 = arith.index_cast %29 : i32 to index
        %31 = memref.load %arg1[%30] : memref<16xi32, #tpu.memory_space<smem>>
        %c8_i32_21 = arith.constant 8 : i32
        %32 = arith.muli %9, %c8_i32_21 : i32
        %33 = arith.addi %32, %28 : i32
        %c0_i32_22 = arith.constant 0 : i32
        %34 = tpu.memref_slice %arg2[%31, %c0_i32_22] : memref<32x32xf32, #tpu.memory_space<any>> -> memref<1x32xf32, #tpu.memory_space<any>>
        %c0_i32_23 = arith.constant 0 : i32
        %35 = tpu.memref_slice %arg4[%33, %c0_i32_23] : memref<16x32xf32, #tpu.memory_space<vmem>> -> memref<1x32xf32, #tpu.memory_space<vmem>>
        %36 = tpu.memref_slice %arg5[%9] : memref<2x!tpu.dma_semaphore, #tpu.memory_space<semaphore_mem>> -> memref<1x!tpu.dma_semaphore, #tpu.memory_space<semaphore_mem>>
        %37 = tpu.memref_squeeze %36 : memref<1x!tpu.dma_semaphore, #tpu.memory_space<semaphore_mem>> -> memref<!tpu.dma_semaphore, #tpu.memory_space<semaphore_mem>>
        tpu.enqueue_dma source(%34 : memref<1x32xf32, #tpu.memory_space<any>>) target(%35 : memref<1x32xf32, #tpu.memory_space<vmem>>) target_semaphore(%37 : memref<!tpu.dma_semaphore, #tpu.memory_space<semaphore_mem>>)
      }
      %c8_i32_18 = arith.constant 8 : i32
    } else {
    }
    %c1_i32_5 = arith.constant 1 : i32
    %13 = arith.addi %arg0, %c1_i32_5 : i32
    %c2_i32_6 = arith.constant 2 : i32
    %14 = arith.cmpi slt, %13, %c2_i32_6 : i32
    %15 = arith.extui %14 : i1 to i32
    %c0_i32_7 = arith.constant 0 : i32
    %16 = arith.cmpi ne, %15, %c0_i32_7 : i32
    scf.if %16 {
      %c1_i32_14 = arith.constant 1 : i32
      %25 = arith.addi %arg0, %c1_i32_14 : i32
      %c1_i32_15 = arith.constant 1 : i32
      %26 = arith.addi %arg0, %c1_i32_15 : i32
      %c2_i32_16 = arith.constant 2 : i32
      %c0_i32_17 = arith.constant 0 : i32
      %27 = arith.cmpi eq, %c2_i32_16, %c0_i32_17 : i32
      %c1_i32_18 = arith.constant 1 : i32
      %28 = arith.select %27, %c1_i32_18, %c2_i32_16 : i32
      %29 = arith.remsi %26, %28 : i32
      %c0_i32_19 = arith.constant 0 : i32
      %30 = arith.cmpi ne, %29, %c0_i32_19 : i32
      %c0_i32_20 = arith.constant 0 : i32
      %31 = arith.cmpi slt, %29, %c0_i32_20 : i32
      %c0_i32_21 = arith.constant 0 : i32
      %32 = arith.cmpi slt, %28, %c0_i32_21 : i32
      %33 = arith.xori %31, %32 : i1
      %34 = arith.andi %33, %30 : i1
      %35 = arith.addi %29, %28 : i32
      %36 = arith.select %34, %35, %29 : i32
      %c8_i32_22 = arith.constant 8 : i32
      %37 = arith.muli %25, %c8_i32_22 : i32
      %c0_i32_23 = arith.constant 0 : i32
      %c8_i32_24 = arith.constant 8 : i32
      %38 = arith.addi %c0_i32_23, %c8_i32_24 : i32
      %c1_i32_25 = arith.constant 1 : i32
      scf.for %arg6 = %c0_i32_23 to %38 step %c1_i32_25  : i32 {
        %c1_i32_27 = arith.constant 1 : i32
        %39 = arith.muli %arg6, %c1_i32_27 : i32
        %c0_i32_28 = arith.constant 0 : i32
        %40 = arith.addi %c0_i32_28, %39 : i32
        %41 = arith.addi %37, %40 : i32
        %42 = arith.index_cast %41 : i32 to index
        %43 = memref.load %arg1[%42] : memref<16xi32, #tpu.memory_space<smem>>
        %c8_i32_29 = arith.constant 8 : i32
        %44 = arith.muli %36, %c8_i32_29 : i32
        %45 = arith.addi %44, %40 : i32
        %c0_i32_30 = arith.constant 0 : i32
        %46 = tpu.memref_slice %arg2[%43, %c0_i32_30] : memref<32x32xf32, #tpu.memory_space<any>> -> memref<1x32xf32, #tpu.memory_space<any>>
        %c0_i32_31 = arith.constant 0 : i32
        %47 = tpu.memref_slice %arg4[%45, %c0_i32_31] : memref<16x32xf32, #tpu.memory_space<vmem>> -> memref<1x32xf32, #tpu.memory_space<vmem>>
        %48 = tpu.memref_slice %arg5[%36] : memref<2x!tpu.dma_semaphore, #tpu.memory_space<semaphore_mem>> -> memref<1x!tpu.dma_semaphore, #tpu.memory_space<semaphore_mem>>
        %49 = tpu.memref_squeeze %48 : memref<1x!tpu.dma_semaphore, #tpu.memory_space<semaphore_mem>> -> memref<!tpu.dma_semaphore, #tpu.memory_space<semaphore_mem>>
        tpu.enqueue_dma source(%46 : memref<1x32xf32, #tpu.memory_space<any>>) target(%47 : memref<1x32xf32, #tpu.memory_space<vmem>>) target_semaphore(%49 : memref<!tpu.dma_semaphore, #tpu.memory_space<semaphore_mem>>)
      }
      %c8_i32_26 = arith.constant 8 : i32
    } else {
    }
    %c0_i32_8 = arith.constant 0 : i32
    %c8_i32 = arith.constant 8 : i32
    %17 = arith.addi %c0_i32_8, %c8_i32 : i32
    %c1_i32_9 = arith.constant 1 : i32
    scf.for %arg6 = %c0_i32_8 to %17 step %c1_i32_9  : i32 {
      %c1_i32_14 = arith.constant 1 : i32
      %25 = arith.muli %arg6, %c1_i32_14 : i32
      %c0_i32_15 = arith.constant 0 : i32
      %26 = arith.addi %c0_i32_15, %25 : i32
      %c8_i32_16 = arith.constant 8 : i32
      %27 = arith.muli %9, %c8_i32_16 : i32
      %28 = arith.addi %27, %26 : i32
      %c0_i32_17 = arith.constant 0 : i32
      %c0_i32_18 = arith.constant 0 : i32
      %29 = tpu.memref_slice %arg2[%c0_i32_17, %c0_i32_18] : memref<32x32xf32, #tpu.memory_space<any>> -> memref<1x32xf32, #tpu.memory_space<any>>
      %c0_i32_19 = arith.constant 0 : i32
      %30 = tpu.memref_slice %arg4[%28, %c0_i32_19] : memref<16x32xf32, #tpu.memory_space<vmem>> -> memref<1x32xf32, #tpu.memory_space<vmem>>
      %31 = tpu.memref_slice %arg5[%9] : memref<2x!tpu.dma_semaphore, #tpu.memory_space<semaphore_mem>> -> memref<1x!tpu.dma_semaphore, #tpu.memory_space<semaphore_mem>>
      %32 = tpu.memref_squeeze %31 : memref<1x!tpu.dma_semaphore, #tpu.memory_space<semaphore_mem>> -> memref<!tpu.dma_semaphore, #tpu.memory_space<semaphore_mem>>
      tpu.wait_dma2 semaphore(%32 : memref<!tpu.dma_semaphore, #tpu.memory_space<semaphore_mem>>) src(%29 : memref<1x32xf32, #tpu.memory_space<any>>) dst(%30 : memref<1x32xf32, #tpu.memory_space<vmem>>)
    }
    %c8_i32_10 = arith.constant 8 : i32
    %c8_i32_11 = arith.constant 8 : i32
    %18 = arith.muli %9, %c8_i32_11 : i32
    %19 = tpu.assume_multiple %18, 8 : i32
    %20 = arith.index_cast %19 : i32 to index
    %c0 = arith.constant 0 : index
    %21 = vector.load %arg4[%20, %c0] : memref<16x32xf32, #tpu.memory_space<vmem>>, vector<8x32xf32>
    %cst = arith.constant 5.65685415 : f32
    %22 = vector.broadcast %cst : f32 to vector<8x32xf32>
    %23 = arith.mulf %21, %22 : vector<8x32xf32>
    %c0_12 = arith.constant 0 : index
    %c0_13 = arith.constant 0 : index
    %24 = vector.load %arg3[%c0_12, %c0_13] : memref<8x32xf32, #tpu.memory_space<vmem>>, vector<8x32xf32>
    tpu.vector_store %arg3[%c0_12, %c0_13], %23 {strides = array<i32>} : memref<8x32xf32, #tpu.memory_space<vmem>>, vector<8x32xf32>,
    return
  }
  func.func @transform_1(%arg0: i32, %arg1: memref<16xi32, #tpu.memory_space<smem>>) -> (i32, i32) {
    %c0_i32 = arith.constant 0 : i32
    %c0_i32_0 = arith.constant 0 : i32
    return %arg0, %c0_i32 : i32, i32
  }
}

</mosaic_0001>

<bundles_post_ra>
// kernel: tpu_custom_call.1
= control target key start
LH: loop header
LB: loop body
LE: loop exit
PB: predicated region body
PF: predicated region fallthrough
CT: control target
= control target key end

     0   :  { %s470_s9 = smov [#allocation5]   ;;  %s634_s0 = inlined_call_operand.hbm [shape: s32[16], index: 0, kind: input, shape index: {}]   ;;  %s635_s1 = inlined_call_operand.hbm [shape: f32[32,32], index: 1, kind: input, shape index: {}]   ;;  %s636_s2 = inlined_call_operand.hbm [shape: f32[16,32], index: 2, kind: output, shape index: {}]  }
   0x1   :  { %8 = dma.hbm_to_smem %s634_s0, 16, %s470_s9, [#allocation4] }
   0x2   :  { %438 = dma.done.wait [#allocation4], 16 }
   0x3   :  { %439 = vsyncadd [#allocation4], 4294967280 }
   0x4   :  { %10 = sfence }
   0x5   :  { %11 = vsyncpa [#allocation7], 0 }
   0x6   :  { %13 = vsyncpa [#allocation7 + $0x1], 0  ;;  %s492_s12 = smov 0   ;;  %s494_s13 = smov 0  }
   0x7   :  { %s496_s14 = smov 0  }
   0x8 LB: > { %s253_s0 = sadd.s32 4294967295, %s456_s14   ;;  %s509_s15 = sadd.s32 1, %s456_s14   ;;  %s456_s14 = sphi %s496_s14, %s645_s14   ;;  %s452_s13 = sphi %s494_s13, %s644_s13   ;;  %s448_s12 = sphi %s492_s12, %s643_s12  }
   0x9   : > { %s22_s16 = ssub.s32 %s456_s14, %s509_s15  ;;  %s25_s17 = sadd.s32 1, %s452_s13 }
   0xa   : > { %p23_p0 = scmp.eq.s32.totalorder %s22_s16, 0  ;;  %p254_p1 = scmp.ne.s32.totalorder %s22_s16, 0 }
   0xb   : > { %p29_p2 = scmp.eq.s32.totalorder %s456_s14, 1  ;;  %p34_p3 = scmp.ne.s32.totalorder %s452_s13, %s448_s12 }
   0xc   : > { %s518_s18 = scalar_select %p23_p0, %s452_s13, %s25_s17  }
   0xd   : > { %p520_p4 = por %p254_p1, %p29_p2  ;;  %p35_p5 = scmp.eq.s32.totalorder %s253_s0, 1 }
   0xe   : > { %p255_p7 = scmp.ge.s32.totalorder %s456_s14, 2 }
   0xf   : > { %p524_p6 = por %p35_p5, %p34_p3  ;;  %s637_s21 = sand.u32 (!%p255_p7), 1, %s452_s13  }
  0x10   : > { %44 = sbr.rel (%p255_p7) target bundleno = 141 (0x8d), region = 12  ;;  %p52_p8 = scmp.lt.s32.totalorder (!%p255_p7), %s456_s14, 0 }
  0x11   : > { %s533_s22 = sshll.u32 (!%p255_p7), %s637_s21, 3  ;;  %s53_s23 = ssub.s32 (!%p255_p7), 0, %s456_s14 }
  0x12   : > { %s257_s24 = smin.u32 (!%p255_p7), %s456_s14, %s53_s23  ;;  %p260_p10 = scmp.ne.s32.totalorder (!%p255_p7), %s456_s14, 0 }
  0x13   : > { %s55_s25 = sand.u32 (!%p255_p7), 1, %s257_s24  }
  0x14   : > { %s56_s26 = ssub.s32 (!%p255_p7), 0, %s55_s25 }
  0x15   : > { %s647_s26 = smov (!%p52_p8, %s56_s26), %s55_s25  ;;  %67 = sbr.rel (%p260_p10) target bundleno = 62 (0x3e), region = 16 }
  0x16   : > { %p259_p9 = scmp.lt.s32.totalorder %s647_s26, 0  ;;  %s62_s27 = sadd.s32 2, %s647_s26 }
  0x17   : > { %s261_s29 = sshll.u32 (!%p260_p10), %s456_s14, 3  ;;  %s542_s30 = smov (!%p260_p10), 0  }
  0x18   : > { %s649_s27 = smov (!%p259_p9, %s62_s27), %s647_s26 }
  0x1a LB: >> { %s262_s3 = sshll.u32 %s649_s27, 3  ;;  %s75_s4 = sadd.s32 %s460_s30, %s261_s29  ;;  %s460_s30 = sphi %s542_s30, %s74_s30  }
  0x1b   : >> { %s78_s5 = sadd.s32 %s460_s30, %s262_s3  ;;  %s76_s6 = sld [smem:[#allocation5 + %s75_s4]] }
  0x1c   : >> { %s81_s7 = scalar_lea.vmem [#allocation2], %s78_s5  ;;  %s82_s16 = scalar_lea.sflag [#allocation3], %s649_s27 }
  0x1d   : >> { %s90_s8 = sshll.u32 %s81_s7, 4  ;;  %s346_s25 = scalar_lea.hbm %s635_s1, 512  ;;  %s91_s8 = int_to_ptr.vmem [resolvable:$true] %s90_s8 }
  0x21   : >> { %s263_s9 = sshll.u32 %s76_s6, 4 }
  0x22   : >> { %s80_s0 = scalar_lea.hbm %s635_s1, %s263_s9 }
  0x23   : >> { %s344_s17 = scalar_lea.hbm %s80_s0, 16  ;;  %p347_p12 = scmp.lt.s32.totalorder %s80_s0, %s635_s1 }
  0x24   : >> { %p345_p11 = scmp.ne.s32.totalorder %s80_s0, %s344_s17  ;;  %p348_p13 = scmp.lt.s32.totalorder %s346_s25, %s344_s17 }
  0x26   : >> { %p349_p0 = por %p348_p13, %p347_p12 }
  0x28   : >> { %p350_p1 = pnand %p349_p0, %p345_p11 }
  0x2a   : >> { %353 = shalt.err (!%p350_p1)  }
  0x2b   : >> { %s354_s3 = scalar_lea.vmem %s91_s8, 16  ;;  %s471_s4 = smov [#allocation2]  }
  0x2c   : >> { %p355_p2 = scmp.ne.s32.totalorder %s91_s8, %s354_s3  ;;  %s356_s5 = sshll.u32 %s471_s4, 4  ;;  %s357_s5 = int_to_ptr.vmem [resolvable:$false] %s356_s5 }
  0x2d   : >> { %s358_s6 = scalar_lea.vmem %s357_s5, 256  ;;  %p359_p3 = scmp.lt.s32.totalorder %s91_s8, %s357_s5 }
  0x2e   : >> { %p360_p5 = scmp.lt.s32.totalorder %s358_s6, %s354_s3 }
  0x30   : >> { %p361_p7 = por %p360_p5, %p359_p3 }
  0x32   : >> { %p362_p8 = pnand %p361_p7, %p355_p2 }
  0x34   : >> { %365 = shalt.err (!%p362_p8)  }
  0x35   : >> { %93 = dma.hbm_to_vmem [thread:$0]  %s80_s0, 16, %s91_s8, %s82_s16 }
  0x36   : >> { %s74_s30 = sadd.s32 1, %s460_s30  }
  0x37   : >> { %p71_p9 = scmp.ge.s32.totalorder %s74_s30, 8  }
  0x39   : > { %73 = sbr.rel (!%p71_p9) target bundleno = 26 (0x1a), region = 90 }
  0x3e PF: > { %p264_p10 = scmp.ge.s32.totalorder %s509_s15, 2 }
  0x3f   : > { %p99_p11 = scmp.lt.s32.totalorder (!%p264_p10), %s509_s15, 0  ;;  %s100_s21 = ssub.s32 (!%p264_p10), 0, %s509_s15 }
  0x40   : > { %98 = sbr.rel (%p264_p10) target bundleno = 109 (0x6d), region = 31  ;;  %s265_s7 = smin.u32 (!%p264_p10), %s100_s21, %s509_s15 }
  0x41   : > { %s278_s9 = sshll.u32 (!%p264_p10), %s456_s14, 3  ;;  %s102_s10 = sand.u32 (!%p264_p10), 1, %s265_s7  }
  0x42   : > { %s570_s8 = sadd.s32 (!%p264_p10), 8, %s278_s9  ;;  %s103_s11 = ssub.s32 (!%p264_p10), 0, %s102_s10 }
  0x43   : > { %s574_s29 = smov (!%p264_p10), 0  }
  0x45   : > { %s651_s11 = smov (!%p99_p11, %s103_s11), %s102_s10 }
  0x46   : > { %p267_p12 = scmp.lt.s32.totalorder %s651_s11, 0  ;;  %s109_s30 = sadd.s32 2, %s651_s11 }
  0x48   : > { %s653_s30 = smov (!%p267_p12, %s109_s30), %s651_s11 }
  0x49 LB: >> { %s269_s0 = sshll.u32 %s653_s30, 3  ;;  %s118_s16 = sadd.s32 %s464_s29, %s570_s8  ;;  %s464_s29 = sphi %s574_s29, %s117_s29  }
  0x4a   : >> { %s121_s17 = sadd.s32 %s464_s29, %s269_s0  ;;  %s119_s23 = sld [smem:[#allocation5 + %s118_s16]] }
  0x4b   : >> { %s124_s24 = scalar_lea.vmem [#allocation2], %s121_s17  ;;  %s125_s6 = scalar_lea.sflag [#allocation3], %s653_s30 }
  0x4c   : >> { %s133_s25 = sshll.u32 %s124_s24, 4  ;;  %s368_s10 = scalar_lea.hbm %s635_s1, 512  ;;  %s134_s25 = int_to_ptr.vmem [resolvable:$true] %s133_s25 }
  0x50   : >> { %s270_s26 = sshll.u32 %s119_s23, 4 }
  0x51   : >> { %s123_s5 = scalar_lea.hbm %s635_s1, %s270_s26 }
  0x52   : >> { %s366_s21 = scalar_lea.hbm %s123_s5, 16  ;;  %p369_p0 = scmp.lt.s32.totalorder %s123_s5, %s635_s1 }
  0x53   : >> { %p367_p13 = scmp.ne.s32.totalorder %s123_s5, %s366_s21  ;;  %p370_p1 = scmp.lt.s32.totalorder %s368_s10, %s366_s21 }
  0x55   : >> { %p371_p2 = por %p370_p1, %p369_p0 }
  0x57   : >> { %p372_p3 = pnand %p371_p2, %p367_p13 }
  0x59   : >> { %375 = shalt.err (!%p372_p3)  }
  0x5a   : >> { %s376_s0 = scalar_lea.vmem %s134_s25, 16  ;;  %s472_s16 = smov [#allocation2]  }
  0x5b   : >> { %p377_p5 = scmp.ne.s32.totalorder %s134_s25, %s376_s0  ;;  %s378_s17 = sshll.u32 %s472_s16, 4  ;;  %s379_s17 = int_to_ptr.vmem [resolvable:$false] %s378_s17 }
  0x5c   : >> { %s380_s23 = scalar_lea.vmem %s379_s17, 256  ;;  %p381_p7 = scmp.lt.s32.totalorder %s134_s25, %s379_s17 }
  0x5d   : >> { %p382_p8 = scmp.lt.s32.totalorder %s380_s23, %s376_s0 }
  0x5f   : >> { %p383_p9 = por %p382_p8, %p381_p7 }
  0x61   : >> { %p384_p10 = pnand %p383_p9, %p377_p5 }
  0x63   : >> { %387 = shalt.err (!%p384_p10)  }
  0x64   : >> { %136 = dma.hbm_to_vmem [thread:$0]  %s123_s5, 16, %s134_s25, %s125_s6 }
  0x65   : >> { %s117_s29 = sadd.s32 1, %s464_s29  }
  0x66   : >> { %p114_p11 = scmp.ge.s32.totalorder %s117_s29, 8  }
  0x68   : > { %116 = sbr.rel (!%p114_p11) target bundleno = 73 (0x49), region = 101 }
  0x6d PF: > { %s466_s28 = smov 0  }
  0x6e LB: >> { %s143_s24 = scalar_lea.sflag [#allocation3], %s649_s27  ;;  %s468_s28 = sphi %s466_s28, %s142_s28  }
  0x6f   : >> { %440 = dma.done.wait %s143_s24, 16 }
  0x70   : >> { %441 = vsyncadd %s143_s24, 4294967280  ;;  %s142_s28 = sadd.s32 1, %s468_s28  }
  0x71   : >> { %p139_p12 = scmp.ge.s32.totalorder %s142_s28, 8  }
  0x72   : > { %s271_s29 = sshll.u32 (%p139_p12), %s649_s27, 3  ;;  %s273_s8 = sshll.u32 (%p139_p12), %s456_s14, 7  ;;  %vm151_vm0 = vcmask (%p139_p12), 261120  }
  0x73   : > { %141 = sbr.rel (!%p139_p12) target bundleno = 110 (0x6e), region = 112  ;;  %s148_s30 = scalar_lea.vmem (%p139_p12), [#allocation2], %s271_s29 }
  0x74   : > { %v149_v0 = vld [vmem:[%s148_s30] sm:$0xff] (%p139_p12)  ;;  %s640_s25 = scalar_lea.vmem (%p139_p12), [#allocation6], %s533_s22  ;;  %s165_s5 = scalar_lea.hbm (%p139_p12), %s636_s2, %s273_s8 }
  0x75   : > { %s167_s26 = sshll.u32 (%p139_p12), %s640_s25, 4  ;;  %v150_v1 = vmul.f32 (%p139_p12), 5.656854, %v149_v0  ;;  %s641_s6 = smov (%p139_p12), %s640_s25  ;;  %s168_s26 = int_to_ptr.vmem [resolvable:$true] %s167_s26 }
  0x76   : > { %s642_s21 = sand.u32 (%p139_p12), 1, %s452_s13   ;;  %s388_s9 = scalar_lea.vmem (%p139_p12), %s168_s26, 128 }
  0x77   : > { %152 = vst.msk [vmem:[%s641_s6] sm:$0xff] (%p139_p12), %vm151_vm0, %v150_v1  ;;  %s154_s7 = scalar_lea.sflag (%p139_p12), [#allocation7], %s642_s21  ;;  %p389_p13 = scmp.ne.s32.totalorder (%p139_p12), %s168_s26, %s388_s9 }
  0x78   : > { %s473_s27 = smov [#allocation6]  }
  0x79   : > { %p390_p0 = pnand %p389_p13, %p520_p4  ;;  %s392_s10 = sshll.u32 %s473_s27, 4  ;;  %s393_s10 = int_to_ptr.vmem [resolvable:$false] %s392_s10 }
  0x7a   : > { %s394_s11 = scalar_lea.vmem %s393_s10, 256  ;;  %p395_p2 = scmp.lt.s32.totalorder %s168_s26, %s393_s10 }
  0x7b   : > { %p391_p1 = pneg %p390_p0  ;;  %p396_p3 = scmp.lt.s32.totalorder %s394_s11, %s388_s9 }
  0x7d   : > { %p397_p5 = por %p396_p3, %p395_p2 }
  0x7f   : > { %p398_p7 = pnand %p397_p5, %p391_p1 }
  0x81   : > { %401 = shalt.err (!%p398_p7)
}
  0x82   : > { %s402_s0 = scalar_lea.hbm %s165_s5, 128  ;;  %s406_s17 = scalar_lea.hbm %s636_s2, 256 }
  0x83   : > { %p403_p8 = scmp.ne.s32.totalorder %s165_s5, %s402_s0  ;;  %p407_p11 = scmp.lt.s32.totalorder %s165_s5, %s636_s2 }
  0x84   : > { %p408_p12 = scmp.lt.s32.totalorder %s406_s17, %s402_s0 }
  0x85   : > { %p404_p9 = pnand %p403_p8, %p520_p4 }
  0x86   : > { %p409_p13 = por %p408_p12, %p407_p11 }
  0x87   : > { %p405_p10 = pneg %p404_p9 }
  0x89   : > { %p410_p0 = pnand %p409_p13, %p405_p10 }
  0x8b   : > { %413 = shalt.err (!%p410_p0)
}
  0x8c   : > { %280 = dma.vmem_to_hbm [thread:$0]  (%p520_p4), %s168_s26, 128, %s165_s5, %s154_s7  }
  0x8d PF: > { %p286_p1 = scmp.ge.s32.totalorder %s456_s14, 1  ;;  %s179_s24 = sand.u32 1, %s448_s12  }
  0x8e   : > { %s180_s29 = scalar_lea.sflag [#allocation7], %s179_s24 }
  0x8f   : > { %p283_p2 = pnand %p286_p1, %p524_p6 }
  0x91   : > { %p284_p3 = pneg %p283_p2 }
  0x93   : > { %443 = dma.done.wait (%p284_p3), %s180_s29, 128  }
  0x94   : > { %445 = vsyncadd (%p284_p3), %s180_s29, 4294967168  ;;  %p16_p5 = scmp.ge.s32.totalorder %s509_s15, 3   ;;  %s643_s12 = smov %s452_s13 }
  0x95   : > { %s644_s13 = smov %s518_s18  ;;  %s645_s14 = smov %s509_s15 }
  0x96   :  { %18 = sbr.rel (!%p16_p5) target bundleno = 8 (0x8), region = 123 }
  0x9b   :  { %185 = vsyncpa [#allocation7], 1 }
  0x9c   :  { %187 = vsyncpa [#allocation7 + $0x1], 1 }
  0x9d   :  { %188 = vsyncmov [#allocation3] }
  0xa0   :  { %s189_s14 = vpop.sfrf %188 }
  0xa1   :  { %p276_p4 = scmp.ne.s32.totalorder %s189_s14, 0 }
  0xa3   :  { %193 = shalt.err (%p276_p4)  }
  0xa4   :  { %195 = vsyncmov [#allocation3 + $0x1] }
  0xa7   :  { %s196_s19 = vpop.sfrf %195 }
  0xa8   :  { %p277_p6 = scmp.ne.s32.totalorder %s196_s19, 0 }
  0xaa   :  { %200 = shalt.err (%p277_p6)  }

</bundles_post_ra>
